<compile_context>
chip_gen: v5e
topology: v5e:2x2
jax: 0.10.0
libtpu: 0.0.40
codegen_flags: <defaults>
</compile_context>

<pallas_src>
import functools

import jax
import jax.numpy as jnp
from jax.experimental import pallas as pl
from jax.experimental.pallas import tpu as pltpu

_MIB = 1024 * 1024


def _round_up(x: int, m: int) -> int:
    return ((x + m - 1) // m) * m


def _cdiv(a: int, b: int) -> int:
    return -(-a // b)


def _tpu_generation():
    try:
        kind = jax.devices()[0].device_kind.lower()
    except Exception:
        return None
    for gen in ("v7", "v6", "v5", "v4", "v3", "v2"):
        if gen in kind:
            return gen
    return None


def _budget_for_generation(gen):
    """Returns (footprint budget, vmem_limit_bytes, max row tile, max hidden tile, min row tiles)."""
    if gen == "v7":
        # 64 MiB physical VMEM, 2 TensorCores/chip -> smaller tiles, >= 2 row tiles.
        return 44 * _MIB, 56 * _MIB, 256, 512, 2
    if gen in ("v6", "v5"):
        # 128 MiB physical VMEM, 1 TC, mem-bound -> big tiles to cut weight re-streaming.
        return 96 * _MIB, 110 * _MIB, 512, 1024, 1
    # Unknown device: stay inside the smallest physical VMEM we might be on (v7x: 64 MiB).
    return 40 * _MIB, 56 * _MIB, 256, 512, 1


def _choose_tiles(n, input_dim, hidden_dim, output_dim,
                  x_bytes, w_bytes, out_bytes, sublane):
    gen = _tpu_generation()
    budget, vmem_limit, max_tm, max_th, min_row_tiles = _budget_for_generation(gen)

    out_pad = _round_up(output_dim, 128)          # lane-dense (unmasked) output stores

    # ---- Row tile: minimize padding waste, keep sublane alignment, and (on v7x) give
    #      both TensorCores at least one row tile.
    if n < min_row_tiles * sublane:
        min_row_tiles = 1

    def _row_tile(target):
        target = max(sublane, target)
        n_tiles = max(min_row_tiles, _cdiv(n, target))
        return _round_up(_cdiv(n, n_tiles), sublane)

    tm = _row_tile(max_tm)

    # ---- Hidden tile candidates (largest first). Prefer tiles that divide hidden_dim so
    #      W1/b1/W2 need no per-call padding (saves a full HBM copy of the weights).
    cands = []
    if hidden_dim <= max_th:
        cands.append(hidden_dim)
    t = (min(max_th, hidden_dim) // 128) * 128
    while t >= 128:
        if hidden_dim % t == 0:
            cands.append(t)
        t -= 128
    if not cands:
        # hidden_dim > max_th with no 128-multiple divisor: fall back to padded chunks.
        cands = [min(_round_up(max_th, 128), _round_up(hidden_dim, 128)), 128]
    cands = sorted(set(cands), reverse=True)

    def _footprint(tm_, th_):
        return (2 * tm_ * input_dim * x_bytes          # x block (double buffered)
                + 2 * input_dim * th_ * w_bytes        # W1 block
                + 2 * _round_up(th_, 128) * 4          # b1 block
                + 2 * th_ * out_pad * w_bytes          # W2 block
                + 2 * out_pad * 4                      # b2 block
                + 2 * tm_ * out_pad * out_bytes        # output block
                + tm_ * out_pad * 4)                   # f32 accumulator scratch

    # Largest hidden tile that fits (fewer reduction steps / acc passes)...
    th = cands[-1]
    for cand in cands:
        if _footprint(tm, cand) <= budget:
            th = cand
            break
    # ...and if even the smallest hidden tile blows the budget, shrink the row tile.
    # TODO(synk): for very large output_dim an output-column grid axis would be better
    #             than shrinking tm (avoids the full (tm, out_pad) residency).
    while _footprint(tm, th) > budget and tm > sublane:
        tm = _round_up(max(sublane, tm // 2), sublane)

    hidden_pad = _round_up(hidden_dim, th)
    n_pad = max(min_row_tiles, _cdiv(n, tm)) * tm
    return tm, th, n_pad, hidden_pad, out_pad, vmem_limit


def _ffn_kernel(x_ref, w1_ref, b1_ref, w2_ref, b2_ref, o_ref, acc_ref):
    k = pl.program_id(1)

    # Initialize the accumulator with b2 (broadcast over rows) so the finalize step is a
    # bare cast + lane-dense store.
    @pl.when(k == 0)
    def _():
        acc_ref[...] = jnp.broadcast_to(b2_ref[...].astype(jnp.float32), acc_ref.shape)

    # First linear on the current hidden chunk: [tm, in] @ [in, th] + [1, th].
    h = jnp.dot(x_ref[...], w1_ref[...], preferred_element_type=jnp.float32)
    h = h + b1_ref[...]

    # Exact (erf-based) GELU — matches PyTorch nn.GELU(approximate='none').
    # TODO(synk): optionally use tanh-approximate GELU (EUP path) when exact parity with
    #             PyTorch is not required.
    h = 0.5 * h * (1.0 + jax.lax.erf(h * (1.0 / jnp.sqrt(2.0))))

    # Dropout(p=0.0) is the identity.

    # Second linear, accumulated over hidden chunks. Casting the LHS to the weight dtype
    # lets bf16 weights drive the bf16 MXU path on v6e/v7x; f32 weights stay exact.
    h = h.astype(w2_ref.dtype)
    acc_ref[...] += jnp.dot(h, w2_ref[...], preferred_element_type=jnp.float32)

    @pl.when(k == pl.num_programs(1) - 1)
    def _():
        o_ref[...] = acc_ref[...].astype(o_ref.dtype)


@jax.jit
def feed_forward(x, w1, b1, w2, b2):
    """x: [N, input_dim]; w1: [input_dim, hidden]; b1: [hidden];
    w2: [hidden, output_dim]; b2: [output_dim]."""
    n, input_dim = x.shape
    hidden_dim = w1.shape[1]
    output_dim = w2.shape[1]
    out_dtype = x.dtype

    sublane = 16 if x.dtype == jnp.bfloat16 else 8
    tm, th, n_pad, hidden_pad, out_pad, vmem_limit = _choose_tiles(
        n, input_dim, hidden_dim, output_dim,
        x.dtype.itemsize, w1.dtype.itemsize, jnp.dtype(out_dtype).itemsize, sublane)

    # Pad only what is actually ragged (nothing for typical 128-aligned transformer dims),
    # so the weights are not copied in HBM on every call. Zero padding is exact:
    # gelu(0) == 0 and zero W2 rows / output columns contribute nothing.
    x_p = x if n_pad == n else jnp.pad(x, ((0, n_pad - n), (0, 0)))
    w1_p = w1 if hidden_pad == hidden_dim else jnp.pad(
        w1, ((0, 0), (0, hidden_pad - hidden_dim)))
    b1_p = b1.reshape(1, -1)
    if hidden_pad != hidden_dim:
        b1_p = jnp.pad(b1_p, ((0, 0), (0, hidden_pad - hidden_dim)))
    w2_p = w2
    if hidden_pad != hidden_dim or out_pad != output_dim:
        w2_p = jnp.pad(w2, ((0, hidden_pad - hidden_dim), (0, out_pad - output_dim)))
    b2_p = b2.reshape(1, -1)
    if out_pad != output_dim:
        b2_p = jnp.pad(b2_p, ((0, 0), (0, out_pad - output_dim)))

    grid = (n_pad // tm, hidden_pad // th)

    out = pl.pallas_call(
        _ffn_kernel,
        out_shape=jax.ShapeDtypeStruct((n_pad, out_pad), out_dtype),
        grid_spec=pltpu.PrefetchScalarGridSpec(
            num_scalar_prefetch=0,
            grid=grid,
            in_specs=[
                pl.BlockSpec((tm, input_dim), lambda i, k: (i, 0)),   # x rows
                pl.BlockSpec((input_dim, th), lambda i, k: (0, k)),   # W1 hidden chunk
                pl.BlockSpec((1, th), lambda i, k: (0, k)),           # b1 hidden chunk
                pl.BlockSpec((th, out_pad), lambda i, k: (k, 0)),     # W2 hidden chunk
                pl.BlockSpec((1, out_pad), lambda i, k: (0, 0)),      # b2 (constant)
            ],
            out_specs=pl.BlockSpec((tm, out_pad), lambda i, k: (i, 0)),
            scratch_shapes=[pltpu.VMEM((tm, out_pad), jnp.float32)],
        ),
        compiler_params=pltpu.CompilerParams(
            dimension_semantics=("parallel", "arbitrary"),
            vmem_limit_bytes=vmem_limit,
        ),
    )(x_p, w1_p, b1_p, w2_p, b2_p)

    if n_pad != n or out_pad != output_dim:
        out = out[:n, :output_dim]
    return out


def _reference(x, w1, b1, w2, b2):
    h = x @ w1 + b1
    h = jax.nn.gelu(h, approximate=False)
    return h @ w2 + b2


if __name__ == "__main__":
    # Small shapes consistent with the module: batch=8, input_dim=32,
    # hidden_dim=64, output_dim=16.
    N, INPUT_DIM, HIDDEN_DIM, OUTPUT_DIM = 8, 32, 64, 16

    key = jax.random.PRNGKey(0)
    kx, kw1, kb1, kw2, kb2 = jax.random.split(key, 5)

    x = jax.random.normal(kx, (N, INPUT_DIM), dtype=jnp.float32)
    # Deterministic parameter init (roughly matches nn.Linear's uniform scale).
    w1 = jax.random.uniform(kw1, (INPUT_DIM, HIDDEN_DIM), jnp.float32,
                            -1.0 / INPUT_DIM ** 0.5, 1.0 / INPUT_DIM ** 0.5)
    b1 = jax.random.uniform(kb1, (HIDDEN_DIM,), jnp.float32,
                            -1.0 / INPUT_DIM ** 0.5, 1.0 / INPUT_DIM ** 0.5)
    w2 = jax.random.uniform(kw2, (HIDDEN_DIM, OUTPUT_DIM), jnp.float32,
                            -1.0 / HIDDEN_DIM ** 0.5, 1.0 / HIDDEN_DIM ** 0.5)
    b2 = jax.random.uniform(kb2, (OUTPUT_DIM,), jnp.float32,
                            -1.0 / HIDDEN_DIM ** 0.5, 1.0 / HIDDEN_DIM ** 0.5)

    out = feed_forward(x, w1, b1, w2, b2)
    out = jax.block_until_ready(out)

    ref = _reference(x, w1, b1, w2, b2)
    assert out.shape == (N, OUTPUT_DIM)
    assert jnp.allclose(out, ref, atol=1e-5, rtol=1e-5), "mismatch vs reference"

    print("KERNEL_OK")
</pallas_src>

<mosaic_0001>
module attributes {stable_mosaic.version = 11 : i64} {
  func.func @_ffn_kernel(%arg0: i32, %arg1: i32, %arg2: memref<8x32xf32, #tpu.memory_space<vmem>>, %arg3: memref<32x64xf32, #tpu.memory_space<vmem>>, %arg4: memref<1x64xf32, #tpu.memory_space<vmem>>, %arg5: memref<64x128xf32, #tpu.memory_space<vmem>>, %arg6: memref<1x128xf32, #tpu.memory_space<vmem>>, %arg7: memref<8x128xf32, #tpu.memory_space<vmem>>, %arg8: memref<8x128xf32, #tpu.memory_space<vmem>>) attributes {dimension_semantics = [#tpu.dimension_semantics<parallel>, #tpu.dimension_semantics<arbitrary>], iteration_bounds = array<i64: 1, 1>, scalar_prefetch = 0 : i64, scratch_operands = 1 : i64, tpu.core_type = #tpu.core_type<tc>, window_params = [{transform_indices = @transform_0, window_bounds = array<i64: 8, 32>}, {transform_indices = @transform_1, window_bounds = array<i64: 32, 64>}, {transform_indices = @transform_2, window_bounds = array<i64: 1, 64>}, {transform_indices = @transform_3, window_bounds = array<i64: 64, 128>}, {pipeline_mode = #tpu.pipeline_mode<synchronous>, transform_indices = @transform_4, window_bounds = array<i64: 1, 128>}, {transform_indices = @transform_5, window_bounds = array<i64: 8, 128>}]} {
    %c0_i32 = arith.constant 0 : i32
    %0 = arith.cmpi eq, %arg1, %c0_i32 : i32
    %1 = arith.extui %0 : i1 to i32
    %c0_i32_0 = arith.constant 0 : i32
    %2 = arith.cmpi ne, %1, %c0_i32_0 : i32
    scf.if %2 {
      %c0_19 = arith.constant 0 : index
      %c0_20 = arith.constant 0 : index
      %27 = vector.load %arg6[%c0_19, %c0_20] : memref<1x128xf32, #tpu.memory_space<vmem>>, vector<1x128xf32>
      %28 = vector.shape_cast %27 : vector<1x128xf32> to vector<1x128xf32>
      %29 = vector.broadcast %28 : vector<1x128xf32> to vector<8x128xf32>
      %c0_21 = arith.constant 0 : index
      %c0_22 = arith.constant 0 : index
      %30 = vector.load %arg8[%c0_21, %c0_22] : memref<8x128xf32, #tpu.memory_space<vmem>>, vector<8x128xf32>
      tpu.vector_store %arg8[%c0_21, %c0_22], %29 {strides = array<i32>} : memref<8x128xf32, #tpu.memory_space<vmem>>, vector<8x128xf32>,
    } else {
    }
    %c0 = arith.constant 0 : index
    %c0_1 = arith.constant 0 : index
    %3 = vector.load %arg2[%c0, %c0_1] : memref<8x32xf32, #tpu.memory_space<vmem>>, vector<8x32xf32>
    %c0_2 = arith.constant 0 : index
    %c0_3 = arith.constant 0 : index
    %4 = vector.load %arg3[%c0_2, %c0_3] : memref<32x64xf32, #tpu.memory_space<vmem>>, vector<32x64xf32>
    %cst = arith.constant dense<0.000000e+00> : vector<8x64xf32>
    %5 = tpu.matmul %3, %4, %cst {dimension_numbers = #tpu.dot_dimension_numbers<[1], [0], [0], [1], [0, 0, 1, 1], [], []>} : vector<8x32xf32>, vector<32x64xf32>, vector<8x64xf32> -> vector<8x64xf32>
    %c0_4 = arith.constant 0 : index
    %c0_5 = arith.constant 0 : index
    %6 = vector.load %arg4[%c0_4, %c0_5] : memref<1x64xf32, #tpu.memory_space<vmem>>, vector<1x64xf32>
    %7 = vector.broadcast %6 : vector<1x64xf32> to vector<8x64xf32>
    %8 = arith.addf %5, %7 : vector<8x64xf32>
    %cst_6 = arith.constant 5.000000e-01 : f32
    %9 = vector.broadcast %cst_6 : f32 to vector<8x64xf32>
    %10 = arith.mulf %9, %8 : vector<8x64xf32>
    %cst_7 = arith.constant 2.000000e+00 : f32
    %11 = math.sqrt %cst_7 : f32
    %cst_8 = arith.constant 1.000000e+00 : f32
    %12 = arith.divf %cst_8, %11 : f32
    %13 = vector.broadcast %12 : f32 to vector<8x64xf32>
    %14 = arith.mulf %8, %13 : vector<8x64xf32>
    %15 = math.erf %14 : vector<8x64xf32>
    %cst_9 = arith.constant 1.000000e+00 : f32
    %16 = vector.broadcast %cst_9 : f32 to vector<8x64xf32>
    %17 = arith.addf %16, %15 : vector<8x64xf32>
    %18 = arith.mulf %10, %17 : vector<8x64xf32>
    %c0_10 = arith.constant 0 : index
    %c0_11 = arith.constant 0 : index
    %19 = vector.load %arg8[%c0_10, %c0_11] : memref<8x128xf32, #tpu.memory_space<vmem>>, vector<8x128xf32>
    %c0_12 = arith.constant 0 : index
    %c0_13 = arith.constant 0 : index
    %20 = vector.load %arg5[%c0_12, %c0_13] : memref<64x128xf32, #tpu.memory_space<vmem>>, vector<64x128xf32>
    %cst_14 = arith.constant dense<0.000000e+00> : vector<8x128xf32>
    %21 = tpu.matmul %18, %20, %cst_14 {dimension_numbers = #tpu.dot_dimension_numbers<[1], [0], [0], [1], [0, 0, 1, 1], [], []>} : vector<8x64xf32>, vector<64x128xf32>, vector<8x128xf32> -> vector<8x128xf32>
    %22 = arith.addf %19, %21 : vector<8x128xf32>
    %c0_15 = arith.constant 0 : index
    %c0_16 = arith.constant 0 : index
    %23 = vector.load %arg8[%c0_15, %c0_16] : memref<8x128xf32, #tpu.memory_space<vmem>>, vector<8x128xf32>
    tpu.vector_store %arg8[%c0_15, %c0_16], %22 {strides = array<i32>} : memref<8x128xf32, #tpu.memory_space<vmem>>, vector<8x128xf32>,
    %c0_i32_17 = arith.constant 0 : i32
    %24 = arith.cmpi eq, %arg1, %c0_i32_17 : i32
    %25 = arith.extui %24 : i1 to i32
    %c0_i32_18 = arith.constant 0 : i32
    %26 = arith.cmpi ne, %25, %c0_i32_18 : i32
    scf.if %26 {
      %c0_19 = arith.constant 0 : index
      %c0_20 = arith.constant 0 : index
      %27 = vector.load %arg8[%c0_19, %c0_20] : memref<8x128xf32, #tpu.memory_space<vmem>>, vector<8x128xf32>
      %c0_21 = arith.constant 0 : index
      %c0_22 = arith.constant 0 : index
      %28 = vector.load %arg7[%c0_21, %c0_22] : memref<8x128xf32, #tpu.memory_space<vmem>>, vector<8x128xf32>
      tpu.vector_store %arg7[%c0_21, %c0_22], %27 {strides = array<i32>} : memref<8x128xf32, #tpu.memory_space<vmem>>, vector<8x128xf32>,
    } else {
    }
    return
  }
  func.func @transform_0(%arg0: i32, %arg1: i32) -> (i32, i32) {
    %c0_i32 = arith.constant 0 : i32
    %c0_i32_0 = arith.constant 0 : i32
    return %arg0, %c0_i32 : i32, i32
  }
  func.func @transform_1(%arg0: i32, %arg1: i32) -> (i32, i32) {
    %c0_i32 = arith.constant 0 : i32
    %c0_i32_0 = arith.constant 0 : i32
    return %c0_i32, %arg1 : i32, i32
  }
  func.func @transform_2(%arg0: i32, %arg1: i32) -> (i32, i32) {
    %c0_i32 = arith.constant 0 : i32
    %c0_i32_0 = arith.constant 0 : i32
    return %c0_i32, %arg1 : i32, i32
  }
  func.func @transform_3(%arg0: i32, %arg1: i32) -> (i32, i32) {
    %c0_i32 = arith.constant 0 : i32
    %c0_i32_0 = arith.constant 0 : i32
    return %arg1, %c0_i32 : i32, i32
  }
  func.func @transform_4(%arg0: i32, %arg1: i32) -> (i32, i32) {
    %c0_i32 = arith.constant 0 : i32
    %c0_i32_0 = arith.constant 0 : i32
    %c0_i32_1 = arith.constant 0 : i32
    return %c0_i32, %c0_i32_0 : i32, i32
  }
  func.func @transform_5(%arg0: i32, %arg1: i32) -> (i32, i32) {
    %c0_i32 = arith.constant 0 : i32
    %c0_i32_0 = arith.constant 0 : i32
    return %arg0, %c0_i32 : i32, i32
  }
}

</mosaic_0001>

<bundles_post_ra>
// kernel: feed_forward.1
= control target key start
LH: loop header
LB: loop body
LE: loop exit
PB: predicated region body
PF: predicated region fallthrough
CT: control target
= control target key end

     0   :  { %s276_s0 = inlined_call_operand.vmem [shape: f32[8,32], index: 0, kind: input, shape index: {}]   ;;  %s277_s1 = inlined_call_operand.vmem [shape: f32[32,64], index: 1, kind: input, shape index: {}]   ;;  %s278_s2 = inlined_call_operand.vmem [shape: f32[1,64], index: 2, kind: input, shape index: {}]   ;;  %s279_s3 = inlined_call_operand.vmem [shape: f32[64,128], index: 3, kind: input, shape index: {}]   ;;  %s280_s4 = inlined_call_operand.vmem [shape: f32[1,128], index: 4, kind: input, shape index: {}]   ;;  %s281_s5 = inlined_call_operand.hbm [shape: f32[8,128], index: 5, kind: output, shape index: {}]  }
   0x1   :  { %v34_v0 = vld [vmem:[%s277_s1 + $0x18] sm:$0xff]  ;;  %v33_v1 = vld [vmem:[%s277_s1 + $0x10] sm:$0xff]  ;;  %v32_v2 = vld [vmem:[%s277_s1 + $0x8] sm:$0xff] }
   0x2   :  { %55 = vmatpush.msra.mxu0 %v34_v0 }
   0x3   :  { %10 = vsyncpa [#allocation4], 0  ;;  %v31_v3 = vld [vmem:[%s277_s1] sm:$0xff]  ;;  %vm39_vm0 = vcmask 261120   ;;  %v115_v11 = vld [vmem:[%s279_s3 + $0x38] sm:$0xff]  ;;  %vm116_vm5 = vcmask 523264  }
   0x4   :  { %56 = vmatpush.msra.mxu0 %v33_v1  ;;  %v30_v4 = vld [vmem:[%s276_s0] sm:$0xff]  ;;  %128 = vmatpush.msra.mxu1 %v115_v11  ;;  %v114_v14 = vld [vmem:[%s279_s3 + $0x30] sm:$0xff]  ;;  %v113_v17 = vld [vmem:[%s279_s3 + $0x28] sm:$0xff]  ;;  %s197_s19 = smov [#allocation3]   ;;  %s154_s23 = sshll.u32 %s281_s5, 4  ;;  %s155_s23 = int_to_ptr.hbm [resolvable:$true] %s154_s23 }
   0x5   :  { %v167_v5 = vld [vmem:[%s278_s2] ss:$0 sm:$0xff]  ;;  %v111_v21 = vld [vmem:[%s279_s3 + $0x18] sm:$0xff]  ;;  %v110_v23 = vld [vmem:[%s279_s3 + $0x10] sm:$0xff]  ;;  %s152_s20 = sshll.u32 %s197_s19, 4  ;;  %s153_s20 = int_to_ptr.vmem [resolvable:$true] %s152_s20 }
   0x6   :  { %57 = vmatpush.msra.mxu0 %v32_v2  ;;  %129 = vmatpush.msra.mxu1 %v114_v14  ;;  %v112_v20 = vld [vmem:[%s279_s3 + $0x20] sm:$0xff]  ;;  %v109_v26 = vld [vmem:[%s279_s3 + $0x8] sm:$0xff] }
   0x7   :  { %v108_v28 = vld [vmem:[%s279_s3] sm:$0xff] }
   0x8   :  { %58 = vmatpush.msra.mxu0 %v31_v3  ;;  %130 = vmatpush.msra.mxu1 %v113_v17  ;;  %v168_v55 = vld [vmem:[%s280_s4] ss:$0 sm:$0xff] }
   0x9   :  { %163 = vmatmul.msk.f32.vlgmr.msra.gmra.mxu0 %vm39_vm0, %v30_v4 }
   0xa   :  { %131 = vmatpush.msra.mxu1 %v112_v20 }
   0xc   :  { %132 = vmatpush.msra.mxu1 %v111_v21 }
   0xe   :  { %133 = vmatpush.msra.mxu1 %v110_v23 }
  0x10   :  { %134 = vmatpush.msra.mxu1 %v109_v26 }
  0x12   :  { %135 = vmatpush.msra.mxu1 %v108_v28 }
  0x86   :  { %v60_v6 = vpop.f32.mrf.mxu0 }
  0x87   :  { %v61_v7 = vadd.f32 %v167_v5, %v60_v6 }
  0x89   :  { %v64_v8 = vmul.f32 0.70710677, %v61_v7  ;;  %v63_v52 = vmul.f32 0.5, %v61_v7 }
  0x8b   :  { %v65_v9 = vmul.f32 %v64_v8, %v64_v8 }
  0x8d   :  { %v66_v10 = vmin.f32 %v65_v9, 16.0 }
  0x8f   :  { %v67_v12 = vmul.f32 2.1237322e-06, %v66_v10  ;;  %v78_v13 = vmul.f32 3.8918573e-05, %v66_v10 }
  0x91   :  { %v68_v15 = vadd.f32 0.00028619796, %v67_v12  ;;  %v79_v16 = vadd.f32 0.001143296, %v78_v13 }
  0x93   :  { %v69_v18 = vmul.f32 %v68_v15, %v66_v10  ;;  %v80_v19 = vmul.f32 %v79_v16, %v66_v10 }
  0x95   :  { %v81_v22 = vadd.f32 0.014752088, %v80_v19  ;;  %v70_v24 = vadd.f32 0.0036580483, %v69_v18 }
  0x97   :  { %v82_v25 = vmul.f32 %v81_v22, %v66_v10  ;;  %v71_v29 = vmul.f32 %v70_v24, %v66_v10 }
  0x99   :  { %v83_v27 = vadd.f32 0.112945676, %v82_v25  ;;  %v72_v32 = vadd.f32 0.05243302, %v71_v29 }
  0x9b   :  { %v84_v30 = vmul.f32 %v83_v27, %v66_v10  ;;  %v73_v35 = vmul.f32 %v72_v32, %v66_v10 }
  0x9d   :  { %v85_v31 = vadd.f32 0.4994258, %v84_v30  ;;  %v74_v36 = vadd.f32 0.18741608, %v73_v35 }
  0x9f   :  { %v86_v33 = vmul.f32 %v85_v31, %v66_v10  ;;  %v75_v38 = vmul.f32 %v74_v36, %v66_v10 }
  0xa1   :  { %v87_v34 = vadd.f32 1.0, %v86_v33  ;;  %v76_v42 = vadd.f32 1.1283791, %v75_v38 }
  0xa3   :  { %169 = vrcp.f32 %v87_v34  ;;  %v99_v41 = vand.u32 2147483648, %v87_v34  ;;  %v97_v44 = vand.u32 2147483647, %v87_v34  ;;  %vm93_vm2 = vweird.f32 %v87_v34 }
  0xa4   :  { %v77_v47 = vmul.f32 %v76_v42, %v64_v8 }
  0xa5   :  { %v100_v46 = vor.u32 1.1754944e-38, %v99_v41  ;;  %vm98_vm4 = vcmp.eq.f32.partialorder %v97_v44, 8.507059e+37 }
  0xa9   :  { %v170_v37 = vpop.eup %169 }
  0xaa   :  { %v89_v39 = vmul.f32 %v170_v37, %v87_v34  ;;  %vm94_vm1 = vweird.f32 %v170_v37 }
  0xab   :  { %vm95_vm3 = vmor %vm93_vm2, %vm94_vm1 }
  0xac   :  { %v90_v40 = vsub.f32 1.0, %v89_v39 }
  0xae   :  { %v91_v43 = vmul.f32 %v170_v37, %v90_v40 }
  0xb0   :  { %v92_v45 = vadd.f32 %v170_v37, %v91_v43 }
  0xb2   :  { %v96_v48 = vsel %vm95_vm3, %v170_v37, %v92_v45 }
  0xb3   :  { %v101_v49 = vsel %vm98_vm4, %v100_v46, %v96_v48 }
  0xb4   :  { %v102_v50 = vmul.f32 %v101_v49, %v77_v47 }
  0xb6   :  { %v164_v51 = vclamps-f32 %v102_v50, 1.0 }
  0xb8   :  { %v105_v53 = vadd.f32 1.0, %v164_v51 }
  0xba   :  { %v106_v54 = vmul.f32 %v105_v53, %v63_v52 }
  0xbc   :  { %165 = vmatmul.msk.f32.vlgmr.msra.gmra.mxu1 %vm116_vm5, %v106_v54 }
 0x139   :  { %v137_v56 = vpop.f32.mrf.mxu1 }
 0x13a   :  { %v140_v57 = vadd.f32 %v168_v55, %v137_v56 }
 0x13c   :  { %146 = vst [vmem:[#allocation3] sm:$0xff] %v140_v57 }
 0x13d   :  { %157 = dma.vmem_to_hbm [thread:$0]  %s153_s20, 128, %s155_s23, [#allocation4]  }
 0x13e   :  { %195 = dma.done.wait [#allocation4], 128  }
 0x13f   :  { %196 = vsyncadd [#allocation4], 4294967168 }
 0x140   :  { %162 = vsyncpa [#allocation4], 1 }

</bundles_post_ra>
